<compile_context>
chip_gen: v6e
topology: v6e:2x2x1
jax: 0.10.0
libtpu: 0.0.40
codegen_flags: <defaults>
</compile_context>

<pallas_src>
import functools

import jax
import jax.numpy as jnp
from jax.experimental import pallas as pl
from jax.experimental.pallas import tpu as pltpu


# ---------------------------------------------------------------------------
# Kernel
# ---------------------------------------------------------------------------
def _attention_block_kernel(g_ref, x_ref,
                            wg_ref, wx_ref, bgx_ref,
                            wpsi_ref, bpsi_ref,
                            out_ref, *, bt):
    """One grid step: `bt` batch samples x one spatial tile.

    g_ref:   (bt, F_g, T)     x_ref:    (bt, F_l, T)
    wg_ref:  (F_int, F_g)     wx_ref:   (F_int, F_l)
    bgx_ref: (F_int, 1)       wpsi_ref: (F_int, 1)    bpsi_ref: (1, 1)
    out_ref: (bt, F_l, T)
    """
    wg = wg_ref[...]
    wx = wx_ref[...]
    bgx = bgx_ref[...]
    wpsi = wpsi_ref[...]
    bpsi = bpsi_ref[...]

    for b in range(bt):                       # static unroll over the batch block
        g = g_ref[b]                          # (F_g, T)
        x = x_ref[b]                          # (F_l, T)

        # Fused W_g(g) + W_x(x) + (b_g + b_x)  -> (F_int, T), lane-dense.
        h = (jnp.dot(wg, g, preferred_element_type=jnp.float32)
             + jnp.dot(wx, x, preferred_element_type=jnp.float32)
             + bgx)
        act = jnp.maximum(h, 0.0)

        # psi: F_int -> 1 "conv" as VPU multiply + sublane (XLU) reduction
        # (kept off the MXU — VPU/XLU have plenty of slack in this mem-bound kernel).
        logits = jnp.sum(act * wpsi, axis=0, keepdims=True) + bpsi
        psi = jax.nn.sigmoid(logits)          # (1, T)

        # Gate: x * psi, broadcast over channel sublanes.
        out_ref[b] = (x.astype(jnp.float32) * psi).astype(out_ref.dtype)


# ---------------------------------------------------------------------------
# Parameter algebra (glue)
# ---------------------------------------------------------------------------
def _fold_bn(w, b, gamma, beta, mean, var, eps=1e-5):
    """Fold eval-mode BatchNorm into a 1x1 conv (weight (Cin, Cout), bias (Cout,))."""
    s = gamma / jnp.sqrt(var + eps)           # (Cout,)
    w_eff = w * s[None, :]
    b_eff = (b - mean) * s + beta
    return w_eff, b_eff


# ---------------------------------------------------------------------------
# Tiling / VMEM budgeting
# ---------------------------------------------------------------------------
def _round_up(v, m):
    return ((v + m - 1) // m) * m


def _largest_divisor(n, cap):
    cap = max(1, min(n, cap))
    for d in range(cap, 0, -1):
        if n % d == 0:
            return d
    return 1


def _vmem_budget_bytes():
    """Per-generation VMEM budget (75% of physical; safe 48 MiB fallback == v7x)."""
    cap = 64 * 1024 * 1024
    try:
        info = pltpu.get_tpu_info()
        cap = int(getattr(info, "vmem_capacity_bytes", cap)) or cap
    except Exception:
        pass
    return (cap * 3) // 4


def _choose_tiling(N, HW, F_g, F_l, F_int, budget, target_elems):
    """Return (B_t, T, n_batch_blocks, n_spatial_blocks)."""
    # Per (sample x spatial element) bytes of one grid step:
    #   double-buffered g/x/out activation tiles + f32 h/act temporaries.
    per_elem = 4 * (2 * (F_g + 2 * F_l) + 2 * F_int)
    # Weights counted at 2x as margin even though they are single-buffered.
    fixed = 4 * 2 * F_int * (F_g + F_l + 2) + (2 << 20)
    max_elems = max(128, (budget - fixed) // per_elem)

    target = max(128, min(int(target_elems), int(max_elems)))
    target = (target // 128) * 128

    HW_lanes = _round_up(HW, 128)

    if HW_lanes <= max_elems and HW < target_elems:
        # Small feature map: full spatial extent, batch several samples per step.
        T, n_sp = HW, 1
        bt_cap = min(max_elems // HW_lanes, max(1, target_elems // HW_lanes))
        B_t = _largest_divisor(N, bt_cap)
    elif HW % 128 == 0:
        # Lane-aligned feature map: tile spatially with an exact divisor (no padding).
        B_t = 1
        T = 128
        for t in range(target, 127, -128):
            if HW % t == 0:
                T = t
                break
        n_sp = HW // T
    elif HW_lanes <= max_elems:
        # Ragged HW that fits as one full-extent block (masked tail stores, no padding).
        B_t, T, n_sp = 1, HW, 1
    else:
        # Ragged, large HW: non-divisible grid.  Out-of-bounds lanes of the last block
        # are garbage on read and dropped on write; every lane is independent, so this
        # is correct without any host-side padding or output slicing.
        B_t, T = 1, target
        n_sp = pl.cdiv(HW, T)

    # Guarantee >= 2 total grid steps so both v7x TensorCores get work.
    if (N // B_t) * n_sp < 2:
        if B_t > 1:
            B_t = _largest_divisor(N, max(1, B_t // 2))
        if (N // B_t) * n_sp < 2 and n_sp == 1 and T % 256 == 0:
            T //= 2
            n_sp = 2

    return B_t, T, N // B_t, n_sp


# ---------------------------------------------------------------------------
# Wrapper
# ---------------------------------------------------------------------------
@functools.partial(jax.jit, static_argnames=("target_tile",))
def attention_block(g, x, params, target_tile=2048):
    """g, x: NCHW arrays (f32 or bf16). Returns NCHW output matching the PyTorch module."""
    N, F_g, H, W = g.shape
    _, F_l, _, _ = x.shape
    F_int = params["wg"].shape[1]
    HW = H * W

    # Fold BN into the three 1x1 convs and orient weights as (Cout, Cin) for the
    # channels-on-sublane layout; fuse the two conv biases.
    wg_eff, bg_eff = _fold_bn(params["wg"], params["bg"],
                              params["bn_g_gamma"], params["bn_g_beta"],
                              params["bn_g_mean"], params["bn_g_var"])
    wx_eff, bx_eff = _fold_bn(params["wx"], params["bx"],
                              params["bn_x_gamma"], params["bn_x_beta"],
                              params["bn_x_mean"], params["bn_x_var"])
    wpsi_eff, bpsi_eff = _fold_bn(params["wpsi"], params["bpsi"],
                                  params["bn_psi_gamma"], params["bn_psi_beta"],
                                  params["bn_psi_mean"], params["bn_psi_var"])

    wg_t = wg_eff.T.astype(jnp.float32)                     # (F_int, F_g)
    wx_t = wx_eff.T.astype(jnp.float32)                     # (F_int, F_l)
    bgx = (bg_eff + bx_eff).reshape(F_int, 1).astype(jnp.float32)
    wpsi = wpsi_eff.reshape(F_int, 1).astype(jnp.float32)
    bpsi = bpsi_eff.reshape(1, 1).astype(jnp.float32)

    # NCHW -> (N, C, H*W): free reshape, no transpose, no padding.
    g3 = g.reshape(N, F_g, HW)
    x3 = x.reshape(N, F_l, HW)

    budget = _vmem_budget_bytes()
    B_t, T, n_batch, n_sp = _choose_tiling(N, HW, F_g, F_l, F_int, budget, target_tile)

    rows = lambda n, i: (n, 0, i)              # activations: tile over batch & spatial
    full = lambda n, i: (0, 0)                 # weights/biases: whole array, constant index

    def wspec(shape):
        # Constant-index blocks: single-buffered — no point double-buffering constants.
        return pl.BlockSpec(shape, full, pipeline_mode=pl.Buffered(1))

    out = pl.pallas_call(
        functools.partial(_attention_block_kernel, bt=B_t),
        out_shape=jax.ShapeDtypeStruct((N, F_l, HW), x.dtype),
        grid_spec=pltpu.PrefetchScalarGridSpec(
            num_scalar_prefetch=0,
            grid=(n_batch, n_sp),
            in_specs=[
                pl.BlockSpec((B_t, F_g, T), rows),
                pl.BlockSpec((B_t, F_l, T), rows),
                wspec((F_int, F_g)),
                wspec((F_int, F_l)),
                wspec((F_int, 1)),
                wspec((F_int, 1)),
                wspec((1, 1)),
            ],
            out_specs=pl.BlockSpec((B_t, F_l, T), rows),
        ),
        compiler_params=pltpu.CompilerParams(
            dimension_semantics=("parallel", "parallel"),
            vmem_limit_bytes=int(budget)),
    )(g3, x3, wg_t, wx_t, bgx, wpsi, bpsi)

    return out.reshape(N, F_l, H, W)


# ---------------------------------------------------------------------------
# Synthetic parameters + pure-JAX reference
# ---------------------------------------------------------------------------
def make_params(key, F_g, F_l, F_int):
    """Deterministic synthetic parameters matching Attention_block.__init__ shapes."""
    ks = jax.random.split(key, 6)
    # 1x1 conv weights stored as (Cin, Cout) — equivalent to PyTorch (Cout, Cin, 1, 1).T
    wg = jax.random.normal(ks[0], (F_g, F_int), jnp.float32) * 0.1
    bg = jax.random.normal(ks[1], (F_int,), jnp.float32) * 0.1
    wx = jax.random.normal(ks[2], (F_l, F_int), jnp.float32) * 0.1
    bx = jax.random.normal(ks[3], (F_int,), jnp.float32) * 0.1
    wpsi = jax.random.normal(ks[4], (F_int, 1), jnp.float32) * 0.1
    bpsi = jax.random.normal(ks[5], (1,), jnp.float32) * 0.1

    def bn(c, off):
        gamma = 1.0 + 0.05 * jnp.arange(c, dtype=jnp.float32)
        beta = 0.02 * jnp.arange(c, dtype=jnp.float32) - 0.01
        mean = 0.1 * jnp.arange(c, dtype=jnp.float32) + off
        var = 1.0 + 0.03 * jnp.arange(c, dtype=jnp.float32)
        return gamma, beta, mean, var

    bn_g = bn(F_int, 0.05)
    bn_x = bn(F_int, -0.05)
    bn_p = bn(1, 0.02)

    return dict(
        wg=wg, bg=bg, wx=wx, bx=bx, wpsi=wpsi, bpsi=bpsi,
        bn_g_gamma=bn_g[0], bn_g_beta=bn_g[1], bn_g_mean=bn_g[2], bn_g_var=bn_g[3],
        bn_x_gamma=bn_x[0], bn_x_beta=bn_x[1], bn_x_mean=bn_x[2], bn_x_var=bn_x[3],
        bn_psi_gamma=bn_p[0], bn_psi_beta=bn_p[1], bn_psi_mean=bn_p[2], bn_psi_var=bn_p[3],
    )


def reference_attention_block(g, x, params, eps=1e-5):
    """Pure-JAX reference mirroring the PyTorch forward (eval-mode BN)."""
    def conv_bn(inp, w, b, gamma, beta, mean, var):
        y = jnp.einsum("nchw,cf->nfhw", inp, w) + b[None, :, None, None]
        y = (y - mean[None, :, None, None]) / jnp.sqrt(var[None, :, None, None] + eps)
        return y * gamma[None, :, None, None] + beta[None, :, None, None]

    g1 = conv_bn(g, params["wg"], params["bg"], params["bn_g_gamma"],
                 params["bn_g_beta"], params["bn_g_mean"], params["bn_g_var"])
    x1 = conv_bn(x, params["wx"], params["bx"], params["bn_x_gamma"],
                 params["bn_x_beta"], params["bn_x_mean"], params["bn_x_var"])
    act = jnp.maximum(g1 + x1, 0.0)
    psi = conv_bn(act, params["wpsi"], params["bpsi"], params["bn_psi_gamma"],
                  params["bn_psi_beta"], params["bn_psi_mean"], params["bn_psi_var"])
    psi = jax.nn.sigmoid(psi)
    return x * psi


if __name__ == "__main__":
    key = jax.random.PRNGKey(0)

    def run_case(N, F_g, F_l, F_int, H, W, salt):
        k_g, k_x, k_p = jax.random.split(jax.random.fold_in(key, salt), 3)
        g = jax.random.normal(k_g, (N, F_g, H, W), jnp.float32)
        x = jax.random.normal(k_x, (N, F_l, H, W), jnp.float32)
        params = make_params(k_p, F_g, F_l, F_int)
        out = jax.block_until_ready(attention_block(g, x, params))
        ref = reference_attention_block(g, x, params)
        assert out.shape == (N, F_l, H, W)
        assert jnp.allclose(out, ref, atol=1e-5, rtol=1e-5), (
            f"mismatch vs reference (N={N}, C=({F_g},{F_l},{F_int}), H={H}, W={W})")

    run_case(2, 4, 4, 8, 16, 16, 0)   # lane-aligned HW, batched-per-step path
    run_case(2, 6, 6, 8, 14, 14, 1)   # ragged HW=196: full-extent masked-store path (no pad)
    run_case(1, 4, 4, 8, 16, 16, 2)   # N=1: spatial split so both v7x TCs get work

    print("KERNEL_OK")
</pallas_src>

<mosaic_0001>
module attributes {stable_mosaic.version = 11 : i64} {
  func.func @_attention_block_kernel(%arg0: i32, %arg1: i32, %arg2: memref<1x4x256xf32, #tpu.memory_space<vmem>>, %arg3: memref<1x4x256xf32, #tpu.memory_space<vmem>>, %arg4: memref<8x4xf32, #tpu.memory_space<vmem>>, %arg5: memref<8x4xf32, #tpu.memory_space<vmem>>, %arg6: memref<8x1xf32, #tpu.memory_space<vmem>>, %arg7: memref<8x1xf32, #tpu.memory_space<vmem>>, %arg8: memref<1x1xf32, #tpu.memory_space<vmem>>, %arg9: memref<1x4x256xf32, #tpu.memory_space<vmem>>) attributes {dimension_semantics = [#tpu.dimension_semantics<parallel>, #tpu.dimension_semantics<parallel>], iteration_bounds = array<i64: 2, 1>, scalar_prefetch = 0 : i64, scratch_operands = 0 : i64, tpu.core_type = #tpu.core_type<tc>, window_params = [{transform_indices = @transform_0, window_bounds = array<i64: 1, 4, 256>}, {transform_indices = @transform_1, window_bounds = array<i64: 1, 4, 256>}, {pipeline_mode = #tpu.pipeline_mode<synchronous>, transform_indices = @transform_2, window_bounds = array<i64: 8, 4>}, {pipeline_mode = #tpu.pipeline_mode<synchronous>, transform_indices = @transform_3, window_bounds = array<i64: 8, 4>}, {pipeline_mode = #tpu.pipeline_mode<synchronous>, transform_indices = @transform_4, window_bounds = array<i64: 8, 1>}, {pipeline_mode = #tpu.pipeline_mode<synchronous>, transform_indices = @transform_5, window_bounds = array<i64: 8, 1>}, {pipeline_mode = #tpu.pipeline_mode<synchronous>, transform_indices = @transform_6, window_bounds = array<i64: 1, 1>}, {transform_indices = @transform_7, window_bounds = array<i64: 1, 4, 256>}]} {
    %c0 = arith.constant 0 : index
    %c0_0 = arith.constant 0 : index
    %0 = vector.load %arg4[%c0, %c0_0] : memref<8x4xf32, #tpu.memory_space<vmem>>, vector<8x4xf32>
    %c0_1 = arith.constant 0 : index
    %c0_2 = arith.constant 0 : index
    %1 = vector.load %arg5[%c0_1, %c0_2] : memref<8x4xf32, #tpu.memory_space<vmem>>, vector<8x4xf32>
    %c0_3 = arith.constant 0 : index
    %c0_4 = arith.constant 0 : index
    %2 = vector.load %arg6[%c0_3, %c0_4] : memref<8x1xf32, #tpu.memory_space<vmem>>, vector<8x1xf32>
    %c0_5 = arith.constant 0 : index
    %c0_6 = arith.constant 0 : index
    %3 = vector.load %arg7[%c0_5, %c0_6] : memref<8x1xf32, #tpu.memory_space<vmem>>, vector<8x1xf32>
    %c0_7 = arith.constant 0 : index
    %c0_8 = arith.constant 0 : index
    %4 = vector.load %arg8[%c0_7, %c0_8] : memref<1x1xf32, #tpu.memory_space<vmem>>, vector<1x1xf32>
    %c0_9 = arith.constant 0 : index
    %c0_10 = arith.constant 0 : index
    %c0_11 = arith.constant 0 : index
    %5 = vector.load %arg2[%c0_9, %c0_10, %c0_11] : memref<1x4x256xf32, #tpu.memory_space<vmem>>, vector<1x4x256xf32>
    %6 = vector.shape_cast %5 : vector<1x4x256xf32> to vector<4x256xf32>
    %c0_12 = arith.constant 0 : index
    %c0_13 = arith.constant 0 : index
    %c0_14 = arith.constant 0 : index
    %7 = vector.load %arg3[%c0_12, %c0_13, %c0_14] : memref<1x4x256xf32, #tpu.memory_space<vmem>>, vector<1x4x256xf32>
    %8 = vector.shape_cast %7 : vector<1x4x256xf32> to vector<4x256xf32>
    %cst = arith.constant dense<0.000000e+00> : vector<8x256xf32>
    %9 = tpu.matmul %0, %6, %cst {dimension_numbers = #tpu.dot_dimension_numbers<[1], [0], [0], [1], [0, 0, 1, 1], [], []>} : vector<8x4xf32>, vector<4x256xf32>, vector<8x256xf32> -> vector<8x256xf32>
    %cst_15 = arith.constant dense<0.000000e+00> : vector<8x256xf32>
    %10 = tpu.matmul %1, %8, %cst_15 {dimension_numbers = #tpu.dot_dimension_numbers<[1], [0], [0], [1], [0, 0, 1, 1], [], []>} : vector<8x4xf32>, vector<4x256xf32>, vector<8x256xf32> -> vector<8x256xf32>
    %11 = arith.addf %9, %10 : vector<8x256xf32>
    %12 = vector.broadcast %2 : vector<8x1xf32> to vector<8x256xf32>
    %13 = arith.addf %11, %12 : vector<8x256xf32>
    %cst_16 = arith.constant 0.000000e+00 : f32
    %14 = vector.broadcast %cst_16 : f32 to vector<8x256xf32>
    %15 = arith.maximumf %13, %14 : vector<8x256xf32>
    %16 = vector.broadcast %3 : vector<8x1xf32> to vector<8x256xf32>
    %17 = arith.mulf %15, %16 : vector<8x256xf32>
    %cst_17 = arith.constant dense<0.000000e+00> : vector<256xf32>
    %18 = vector.multi_reduction <add>, %17, %cst_17 [0] : vector<8x256xf32> to vector<256xf32>
    %19 = vector.shape_cast %18 : vector<256xf32> to vector<1x256xf32>
    %20 = vector.broadcast %4 : vector<1x1xf32> to vector<1x256xf32>
    %21 = arith.addf %19, %20 : vector<1x256xf32>
    %22 = arith.negf %21 : vector<1x256xf32>
    %23 = math.exp %22 : vector<1x256xf32>
    %cst_18 = arith.constant 1.000000e+00 : f32
    %24 = vector.broadcast %cst_18 : f32 to vector<1x256xf32>
    %25 = arith.addf %24, %23 : vector<1x256xf32>
    %26 = arith.divf %24, %25 : vector<1x256xf32>
    %27 = vector.broadcast %26 : vector<1x256xf32> to vector<4x256xf32>
    %28 = arith.mulf %8, %27 : vector<4x256xf32>
    %c0_19 = arith.constant 0 : index
    %c0_20 = arith.constant 0 : index
    %c0_21 = arith.constant 0 : index
    %29 = vector.load %arg9[%c0_19, %c0_20, %c0_21] : memref<1x4x256xf32, #tpu.memory_space<vmem>>, vector<1x4x256xf32>
    %30 = vector.shape_cast %29 : vector<1x4x256xf32> to vector<4x256xf32>
    %31 = vector.shape_cast %28 : vector<4x256xf32> to vector<1x4x256xf32>
    tpu.vector_store %arg9[%c0_19, %c0_20, %c0_21], %31 {strides = array<i32>} : memref<1x4x256xf32, #tpu.memory_space<vmem>>, vector<1x4x256xf32>,
    return
  }
  func.func @transform_0(%arg0: i32, %arg1: i32) -> (i32, i32, i32) {
    %c0_i32 = arith.constant 0 : i32
    %c0_i32_0 = arith.constant 0 : i32
    return %arg0, %c0_i32, %arg1 : i32, i32, i32
  }
  func.func @transform_1(%arg0: i32, %arg1: i32) -> (i32, i32, i32) {
    %c0_i32 = arith.constant 0 : i32
    %c0_i32_0 = arith.constant 0 : i32
    return %arg0, %c0_i32, %arg1 : i32, i32, i32
  }
  func.func @transform_2(%arg0: i32, %arg1: i32) -> (i32, i32) {
    %c0_i32 = arith.constant 0 : i32
    %c0_i32_0 = arith.constant 0 : i32
    %c0_i32_1 = arith.constant 0 : i32
    return %c0_i32, %c0_i32_0 : i32, i32
  }
  func.func @transform_3(%arg0: i32, %arg1: i32) -> (i32, i32) {
    %c0_i32 = arith.constant 0 : i32
    %c0_i32_0 = arith.constant 0 : i32
    %c0_i32_1 = arith.constant 0 : i32
    return %c0_i32, %c0_i32_0 : i32, i32
  }
  func.func @transform_4(%arg0: i32, %arg1: i32) -> (i32, i32) {
    %c0_i32 = arith.constant 0 : i32
    %c0_i32_0 = arith.constant 0 : i32
    %c0_i32_1 = arith.constant 0 : i32
    return %c0_i32, %c0_i32_0 : i32, i32
  }
  func.func @transform_5(%arg0: i32, %arg1: i32) -> (i32, i32) {
    %c0_i32 = arith.constant 0 : i32
    %c0_i32_0 = arith.constant 0 : i32
    %c0_i32_1 = arith.constant 0 : i32
    return %c0_i32, %c0_i32_0 : i32, i32
  }
  func.func @transform_6(%arg0: i32, %arg1: i32) -> (i32, i32) {
    %c0_i32 = arith.constant 0 : i32
    %c0_i32_0 = arith.constant 0 : i32
    %c0_i32_1 = arith.constant 0 : i32
    return %c0_i32, %c0_i32_0 : i32, i32
  }
  func.func @transform_7(%arg0: i32, %arg1: i32) -> (i32, i32, i32) {
    %c0_i32 = arith.constant 0 : i32
    %c0_i32_0 = arith.constant 0 : i32
    return %arg0, %c0_i32, %arg1 : i32, i32, i32
  }
}

</mosaic_0001>

<bundles_post_ra>
// kernel: attention_block.1
= control target key start
LH: loop header
LB: loop body
LE: loop exit
PB: predicated region body
PF: predicated region fallthrough
CT: control target
= control target key end

     0   :  { %s818_s26 = smov 0   ;;  %s820_s27 = smov 0   ;;  %s877_s0 = inlined_call_operand.vmem [shape: f32[2,4,256], index: 0, kind: input, shape index: {}]   ;;  %s878_s1 = inlined_call_operand.vmem [shape: f32[2,4,256], index: 1, kind: input, shape index: {}]   ;;  %s879_s2 = inlined_call_operand.vmem [shape: f32[8,4], index: 2, kind: input, shape index: {}]   ;;  %s880_s3 = inlined_call_operand.vmem [shape: f32[8,4], index: 3, kind: input, shape index: {}]   ;;  %s881_s4 = inlined_call_operand.vmem [shape: f32[8,1], index: 4, kind: input, shape index: {}]   ;;  %s882_s5 = inlined_call_operand.vmem [shape: f32[8,1], index: 5, kind: input, shape index: {}]   ;;  %s883_s6 = inlined_call_operand.<no memory space> [shape: f32[1,1], index: 6, kind: input, shape index: {}]   ;;  %s884_s7 = inlined_call_operand.vmem [shape: f32[2,4,256], index: 7, kind: output, shape index: {}]  }
   0x1   :  { %v12_v0 = vstv %s883_s6  ;;  %s822_s28 = smov 0  }
   0x2   :  { %13 = vst [vmem:[#allocation2] sm:$0x1] %v12_v0 }
   0x3 LB: > { %s31_s6 = sadd.s32 1, %s767_s27  ;;  %p691_p0 = scmp.ge.s32.totalorder %s771_s28, 1  ;;  %s771_s28 = sphi %s822_s28, %s19_s28   ;;  %s767_s27 = sphi %s820_s27, %s886_s27   ;;  %s763_s26 = sphi %s818_s26, %s885_s26  }
   0x4   : > { %p33_p1 = scmp.ge.s32.totalorder %s31_s6, 2  ;;  %p277_p2 = scmp.lt.s32.totalorder %s771_s28, 3 }
   0x6   : > { %s888_s6 = smov (%p33_p1, %s31_s6), 0  ;;  %p278_p3 = pnand %p691_p0, %p277_p2 }
   0x7   : > { %p327_p4 = scmp.lt.s32.totalorder (!%p278_p3), %s763_s26, 1 }
   0x8   : > { %281 = sbr.rel (%p278_p3) target bundleno = 276 (0x114), region = 48 }
   0xd   : > { %v773_v1 = vmov 0.0   ;;  %v358_v2 = vld [vmem:[%s881_s4] sm:$0xff]  ;;  %s890_s26 = smov (!%p327_p4, %s763_s26), 1  ;;  %v774_v4 = vmov 0   ;;  %vm369_vm0 = vcmask 1043456   ;;  %vm365_vm1 = vcmask 31744  }
   0xe   : > { %438 = vmatprep.mubr.f32.mxu0 %v773_v1  ;;  %518 = vmatprep.mubr.f32.mxu1 %v773_v1  ;;  %v360_v3 = vld [vmem:[#allocation2] sm:$0x1]  ;;  %s839_s8 = sshll.u32 %s890_s26, 3  ;;  %v558_v22 = vlaneseq }
   0xf   : > { %737 = vset.pattern.permute.xlu0 %v774_v4  ;;  %738 = vset.pattern.permute.xlu1 %v774_v4  ;;  %v359_v5 = vld [vmem:[%s882_s5] sm:$0xff]  ;;  %s344_s13 = scalar_lea.vmem %s878_s1, %s839_s8  ;;  %s334_s16 = scalar_lea.vmem %s877_s0, %s839_s8 }
  0x10   : > { %527 = vperm.xlu0 %737, %v358_v2   ;;  %555 = vperm.xlu1 %738, %v360_v3   ;;  %v848_v6 = vld [vmem:[%s344_s13] sm:$0xff]  ;;  %v559_v28 = vshrl.u32 %v558_v22, 7  ;;  %s354_s23 = scalar_lea.vmem %s884_s7, %s839_s8 }
  0x11   : > { %v364_v7 = vcombine.high %v848_v6, %v848_v6  ;;  %v361_v8 = vld [vmem:[%s334_s16] sm:$0xff] }
  0x12   : > { %v446_v9 = vcombine.high %v361_v8, %v361_v8  ;;  %v357_v10 = vld [vmem:[%s880_s3] sm:$0xff]  ;;  %v560_v33 = vsub.s32 0, %v559_v28 }
  0x13   : > { %698 = vmatprep.subr.msk.mxu0 %vm369_vm0, %v364_v7  ;;  %v356_v11 = vld [vmem:[%s879_s2] sm:$0xff] }
  0x14   : > { %536 = vperm.xlu0 %737, %v359_v5   ;;  %701 = vmatprep.subr.msk.mxu1 %vm369_vm0, %v446_v9 }
  0x15   : > { %699 = vmatpush1.msk.msra.mxu0 %vm369_vm0, %v848_v6  ;;  %702 = vmatpush1.msk.msra.mxu1 %vm369_vm0, %v361_v8 }
  0x16   : > { %700 = vmatmul.mubr.msk.f32.vlgmr.msra.gmra.mxu0 %vm365_vm1, %v357_v10  ;;  %703 = vmatmul.mubr.msk.f32.vlgmr.msra.gmra.mxu1 %vm365_vm1, %v356_v11 }
  0x8b   : > { %v528_v13 = vpop.permute.xlu0 %527  ;;  %v556_v34 = vpop.permute.xlu1 %555 }
  0x8c   : > { %v561_v39 = vrot.slane %v556_v34, %v560_v33 }
  0x8f   : > { %v537_v23 = vpop.permute.xlu0 %536 }
  0xd6   : > { %v440_v12 = vpop.f32.mrf.mxu0  ;;  %v520_v14 = vpop.f32.mrf.mxu1 }
  0xd7   : > { %v521_v15 = vadd.f32 %v520_v14, %v440_v12 }
  0xd8   : > { %v442_v16 = vpop.f32.mrf.mxu0  ;;  %v522_v17 = vpop.f32.mrf.mxu1 }
  0xd9   : > { %v530_v18 = vadd.f32 %v528_v13, %v521_v15  ;;  %v523_v19 = vadd.f32 %v522_v17, %v442_v16 }
  0xdb   : > { %v531_v20 = vadd.f32 %v528_v13, %v523_v19  ;;  %v532_v21 = vmax.f32 %v530_v18, 0.0 }
  0xdd   : > { %v533_v24 = vmax.f32 %v531_v20, 0.0  ;;  %v539_v25 = vmul.f32 %v537_v23, %v532_v21 }
  0xdf   : > { %v540_v26 = vmul.f32 %v537_v23, %v533_v24  ;;  %v541_v27 = vrot.slane %v539_v25, 4 }
  0xe1   : > { %v542_v29 = vadd.f32 %v541_v27, %v539_v25  ;;  %v547_v30 = vrot.slane %v540_v26, 4 }
  0xe3   : > { %v543_v31 = vrot.slane %v542_v29, 2  ;;  %v548_v32 = vadd.f32 %v547_v30, %v540_v26 }
  0xe5   : > { %v544_v35 = vadd.f32 %v543_v31, %v542_v29  ;;  %v549_v36 = vrot.slane %v548_v32, 2 }
  0xe7   : > { %v550_v37 = vadd.f32 %v549_v36, %v548_v32  ;;  %v545_v38 = vrot.slane %v544_v35, 1 }
  0xe9   : > { %v546_v40 = vadd.f32 %v545_v38, %v544_v35  ;;  %v551_v41 = vrot.slane %v550_v37, 1 }
  0xeb   : > { %v552_v42 = vadd.f32 %v551_v41, %v550_v37  ;;  %v562_v43 = vadd.f32 %v561_v39, %v546_v40 }
  0xed   : > { %v563_v44 = vadd.f32 %v561_v39, %v552_v42  ;;  %v704_v45 = vmul.f32 -1.442695, %v562_v43 }
  0xef   : > { %741 = vpow2.f32 %v704_v45  ;;  %v705_v46 = vmul.f32 -1.442695, %v563_v44 }
  0xf1   : > { %743 = vpow2.f32 %v705_v46 }
  0xfc   : > { %v742_v47 = vpop.eup %741 }
  0xfd   : > { %v570_v48 = vadd.f32 1.0, %v742_v47 }
  0xfe   : > { %v744_v49 = vpop.eup %743 }
  0xff   : > { %v571_v50 = vadd.f32 1.0, %v744_v49  ;;  %745 = vrcp.f32 %v570_v48 }
 0x101   : > { %747 = vrcp.f32 %v571_v50 }
 0x10c   : > { %v746_v51 = vpop.eup %745 }
 0x10e   : > { %v748_v52 = vpop.eup %747 }
 0x10f   : > { %v578_v53 = vcombine.low %v746_v51, %v748_v52 }
 0x111   : > { %v580_v54 = vmul.f32 %v578_v53, %v848_v6 }
 0x113   : > { %581 = vst [vmem:[%s354_s23] sm:$0xff] %v580_v54 }
 0x114 PF: > { %s19_s28 = sadd.s32 1, %s771_s28   ;;  %s885_s26 = smov %s767_s27 }
 0x115   : > { %p16_p5 = scmp.ge.s32.totalorder %s19_s28, 4   ;;  %s886_s27 = smov %s888_s6 }
 0x117   :  { %18 = sbr.rel (!%p16_p5) target bundleno = 3 (0x3), region = 81 }

</bundles_post_ra>
